<compile_context>
chip_gen: v5e
topology: v5e:2x2
jax: 0.10.0
libtpu: 0.0.40
codegen_flags: <defaults>
</compile_context>

<pallas_src>
import jax
import jax.numpy as jnp
from jax.experimental import pallas as pl
from jax.experimental.pallas import tpu as pltpu


def _round_up(x: int, m: int) -> int:
    return ((x + m - 1) // m) * m


def bert_output_kernel(x_ref, w1_ref, b1_ref, w2_ref, b2_ref, o_ref):
    # TODO(synk): dropout omitted (module run in eval mode; identity).
    x = x_ref[...]
    # dense: x @ W1 + b1, accumulate in f32 on the MXU
    h = jnp.dot(x, w1_ref[...], preferred_element_type=jnp.float32)
    h = jnp.tanh(h + b1_ref[...])
    # Feed the second matmul in the input dtype (bf16 fast path; no-op for f32).
    h = h.astype(x_ref.dtype)
    # out_proj: h @ W2 + b2 (W2/b2 are lane-padded to Lp columns)
    y = jnp.dot(h, w2_ref[...], preferred_element_type=jnp.float32)
    y = y + b2_ref[...]
    o_ref[...] = y.astype(o_ref.dtype)


def bert_output_layer(x, w1, b1, w2, b2, *, tm=512):
    """x: [B, S, H]; w1: [H, H]; b1: [H]; w2: [H, L]; b2: [L] -> [B, S, L]."""
    B, S, H = x.shape
    L = w2.shape[1]
    rows = B * S
    itemsize = jnp.dtype(x.dtype).itemsize

    # Row-tile size: multiple of 8 sublanes, no larger than (padded) row count.
    TM = min(tm, _round_up(rows, 8))
    rows_p = _round_up(rows, TM)

    # Lane-dense output: pad num_labels up to a multiple of 128.
    Lp = _round_up(max(L, 128), 128)

    x2d = x.reshape(rows, H)
    if rows_p != rows:
        x2d = jnp.pad(x2d, ((0, rows_p - rows), (0, 0)))
    w2_p = jnp.pad(w2, ((0, 0), (0, Lp - L))) if Lp != L else w2
    b2_p = jnp.pad(b2, (0, Lp - L)) if Lp != L else b2
    b1_2d = b1.reshape(1, H)
    b2_2d = b2_p.reshape(1, Lp)

    grid = (pl.cdiv(rows_p, TM),)

    # Rough VMEM budget: double-buffered x/out tiles, resident weights,
    # f32 intermediates; clamp so it stays within v7x's 64 MiB physical VMEM.
    needed = (
        2 * TM * H * itemsize            # x tiles (double buffered)
        + 2 * TM * Lp * itemsize         # out tiles (double buffered)
        + 2 * (H * H + H) * itemsize     # W1 + b1
        + 2 * (H * Lp + Lp) * itemsize   # W2 + b2
        + 2 * TM * max(H, Lp) * 4        # f32 intermediates headroom
    )
    vmem_limit = min(max(int(needed) + (8 << 20), 32 << 20), 56 << 20)

    cost = pl.CostEstimate(
        flops=2 * rows_p * H * H + 2 * rows_p * H * Lp,
        transcendentals=rows_p * H,
        bytes_accessed=(
            rows_p * H * itemsize
            + (H * H + H) * itemsize
            + (H * Lp + Lp) * itemsize
            + rows_p * Lp * itemsize
        ),
    )

    out = pl.pallas_call(
        bert_output_kernel,
        out_shape=jax.ShapeDtypeStruct((rows_p, Lp), x.dtype),
        grid_spec=pl.GridSpec(
            grid=grid,
            in_specs=[
                pl.BlockSpec((TM, H), lambda i: (i, 0)),   # x row tile
                pl.BlockSpec((H, H), lambda i: (0, 0)),    # W1 (resident)
                pl.BlockSpec((1, H), lambda i: (0, 0)),    # b1 (resident)
                pl.BlockSpec((H, Lp), lambda i: (0, 0)),   # W2 padded (resident)
                pl.BlockSpec((1, Lp), lambda i: (0, 0)),   # b2 padded (resident)
            ],
            out_specs=pl.BlockSpec((TM, Lp), lambda i: (i, 0)),
        ),
        compiler_params=pltpu.CompilerParams(
            dimension_semantics=("parallel",),
            vmem_limit_bytes=vmem_limit,
        ),
        cost_estimate=cost,
    )(x2d, w1, b1_2d, w2_p, b2_2d)

    return out[:rows, :L].reshape(B, S, L)


def reference(x, w1, b1, w2, b2):
    h = jnp.tanh(jnp.dot(x, w1) + b1)
    return jnp.dot(h, w2) + b2


if __name__ == "__main__":
    # config: hidden_size=32, num_labels=4, hidden_dropout_prob unused (eval)
    B, S, H, L = 2, 8, 32, 4

    key = jax.random.PRNGKey(0)
    kx, kw1, kb1, kw2, kb2 = jax.random.split(key, 5)

    x = jax.random.normal(kx, (B, S, H), dtype=jnp.float32)
    # PyTorch Linear stores weight as (out, in); here already transposed to (in, out).
    w1 = jax.random.normal(kw1, (H, H), dtype=jnp.float32) * 0.02
    b1 = jax.random.normal(kb1, (H,), dtype=jnp.float32) * 0.02
    w2 = jax.random.normal(kw2, (H, L), dtype=jnp.float32) * 0.02
    b2 = jax.random.normal(kb2, (L,), dtype=jnp.float32) * 0.02

    out = bert_output_layer(x, w1, b1, w2, b2)
    out = jax.block_until_ready(out)

    ref = reference(x, w1, b1, w2, b2)
    assert out.shape == (B, S, L)
    assert jnp.allclose(out, ref, atol=1e-5, rtol=1e-5)

    print("KERNEL_OK")
</pallas_src>

<mosaic_0001>
module attributes {stable_mosaic.version = 11 : i64} {
  func.func @bert_output_kernel(%arg0: i32, %arg1: memref<16x32xf32, #tpu.memory_space<vmem>>, %arg2: memref<32x32xf32, #tpu.memory_space<vmem>>, %arg3: memref<1x32xf32, #tpu.memory_space<vmem>>, %arg4: memref<32x128xf32, #tpu.memory_space<vmem>>, %arg5: memref<1x128xf32, #tpu.memory_space<vmem>>, %arg6: memref<16x128xf32, #tpu.memory_space<vmem>>) attributes {dimension_semantics = [#tpu.dimension_semantics<parallel>], iteration_bounds = array<i64: 1>, scalar_prefetch = 0 : i64, scratch_operands = 0 : i64, tpu.core_type = #tpu.core_type<tc>, window_params = [{transform_indices = @transform_0, window_bounds = array<i64: 16, 32>}, {pipeline_mode = #tpu.pipeline_mode<synchronous>, transform_indices = @transform_1, window_bounds = array<i64: 32, 32>}, {pipeline_mode = #tpu.pipeline_mode<synchronous>, transform_indices = @transform_2, window_bounds = array<i64: 1, 32>}, {pipeline_mode = #tpu.pipeline_mode<synchronous>, transform_indices = @transform_3, window_bounds = array<i64: 32, 128>}, {pipeline_mode = #tpu.pipeline_mode<synchronous>, transform_indices = @transform_4, window_bounds = array<i64: 1, 128>}, {transform_indices = @transform_5, window_bounds = array<i64: 16, 128>}]} {
    %c0 = arith.constant 0 : index
    %c0_0 = arith.constant 0 : index
    %0 = vector.load %arg1[%c0, %c0_0] : memref<16x32xf32, #tpu.memory_space<vmem>>, vector<16x32xf32>
    %c0_1 = arith.constant 0 : index
    %c0_2 = arith.constant 0 : index
    %1 = vector.load %arg2[%c0_1, %c0_2] : memref<32x32xf32, #tpu.memory_space<vmem>>, vector<32x32xf32>
    %cst = arith.constant dense<0.000000e+00> : vector<16x32xf32>
    %2 = tpu.matmul %0, %1, %cst {dimension_numbers = #tpu.dot_dimension_numbers<[1], [0], [0], [1], [0, 0, 1, 1], [], []>} : vector<16x32xf32>, vector<32x32xf32>, vector<16x32xf32> -> vector<16x32xf32>
    %c0_3 = arith.constant 0 : index
    %c0_4 = arith.constant 0 : index
    %3 = vector.load %arg3[%c0_3, %c0_4] : memref<1x32xf32, #tpu.memory_space<vmem>>, vector<1x32xf32>
    %4 = vector.broadcast %3 : vector<1x32xf32> to vector<16x32xf32>
    %5 = arith.addf %2, %4 : vector<16x32xf32>
    %6 = math.tanh %5 : vector<16x32xf32>
    %c0_5 = arith.constant 0 : index
    %c0_6 = arith.constant 0 : index
    %7 = vector.load %arg4[%c0_5, %c0_6] : memref<32x128xf32, #tpu.memory_space<vmem>>, vector<32x128xf32>
    %cst_7 = arith.constant dense<0.000000e+00> : vector<16x128xf32>
    %8 = tpu.matmul %6, %7, %cst_7 {dimension_numbers = #tpu.dot_dimension_numbers<[1], [0], [0], [1], [0, 0, 1, 1], [], []>} : vector<16x32xf32>, vector<32x128xf32>, vector<16x128xf32> -> vector<16x128xf32>
    %c0_8 = arith.constant 0 : index
    %c0_9 = arith.constant 0 : index
    %9 = vector.load %arg5[%c0_8, %c0_9] : memref<1x128xf32, #tpu.memory_space<vmem>>, vector<1x128xf32>
    %10 = vector.broadcast %9 : vector<1x128xf32> to vector<16x128xf32>
    %11 = arith.addf %8, %10 : vector<16x128xf32>
    %c0_10 = arith.constant 0 : index
    %c0_11 = arith.constant 0 : index
    %12 = vector.load %arg6[%c0_10, %c0_11] : memref<16x128xf32, #tpu.memory_space<vmem>>, vector<16x128xf32>
    tpu.vector_store %arg6[%c0_10, %c0_11], %11 {strides = array<i32>} : memref<16x128xf32, #tpu.memory_space<vmem>>, vector<16x128xf32>,
    return
  }
  func.func @transform_0(%arg0: i32) -> (i32, i32) {
    %c0_i32 = arith.constant 0 : i32
    %c0_i32_0 = arith.constant 0 : i32
    return %arg0, %c0_i32 : i32, i32
  }
  func.func @transform_1(%arg0: i32) -> (i32, i32) {
    %c0_i32 = arith.constant 0 : i32
    %c0_i32_0 = arith.constant 0 : i32
    %c0_i32_1 = arith.constant 0 : i32
    return %c0_i32, %c0_i32_0 : i32, i32
  }
  func.func @transform_2(%arg0: i32) -> (i32, i32) {
    %c0_i32 = arith.constant 0 : i32
    %c0_i32_0 = arith.constant 0 : i32
    %c0_i32_1 = arith.constant 0 : i32
    return %c0_i32, %c0_i32_0 : i32, i32
  }
  func.func @transform_3(%arg0: i32) -> (i32, i32) {
    %c0_i32 = arith.constant 0 : i32
    %c0_i32_0 = arith.constant 0 : i32
    %c0_i32_1 = arith.constant 0 : i32
    return %c0_i32, %c0_i32_0 : i32, i32
  }
  func.func @transform_4(%arg0: i32) -> (i32, i32) {
    %c0_i32 = arith.constant 0 : i32
    %c0_i32_0 = arith.constant 0 : i32
    %c0_i32_1 = arith.constant 0 : i32
    return %c0_i32, %c0_i32_0 : i32, i32
  }
  func.func @transform_5(%arg0: i32) -> (i32, i32) {
    %c0_i32 = arith.constant 0 : i32
    %c0_i32_0 = arith.constant 0 : i32
    return %arg0, %c0_i32 : i32, i32
  }
}

</mosaic_0001>

<bundles_post_ra>
// kernel: tpu_custom_call.1
= control target key start
LH: loop header
LB: loop body
LE: loop exit
PB: predicated region body
PF: predicated region fallthrough
CT: control target
= control target key end

     0   :  { %10 = vsyncpa [#allocation3], 0  ;;  %s365_s0 = inlined_call_operand.hbm [shape: f32[16,32], index: 0, kind: input, shape index: {}]   ;;  %s366_s1 = inlined_call_operand.hbm [shape: f32[32,32], index: 1, kind: input, shape index: {}]   ;;  %s367_s2 = inlined_call_operand.vmem [shape: f32[1,32], index: 2, kind: input, shape index: {}]   ;;  %s368_s3 = inlined_call_operand.hbm [shape: f32[32,128], index: 3, kind: input, shape index: {}]   ;;  %s369_s4 = inlined_call_operand.vmem [shape: f32[1,128], index: 4, kind: input, shape index: {}]   ;;  %s370_s5 = inlined_call_operand.hbm [shape: f32[16,128], index: 5, kind: output, shape index: {}]  }
   0x1   :  { %11 = vsyncpa [#allocation6], 0 }
   0x2   :  { %12 = vsyncpa [#allocation4], 0  ;;  %s30_s20 = sshll.u32 %s366_s1, 4  ;;  %s295_s21 = smov [#allocation5]   ;;  %s31_s20 = int_to_ptr.hbm [resolvable:$true] %s30_s20 }
   0x3   :  { %s32_s22 = sshll.u32 %s295_s21, 4  ;;  %s17_s25 = sshll.u32 %s365_s0, 4  ;;  %s33_s22 = int_to_ptr.vmem [resolvable:$true] %s32_s22  ;;  %s18_s25 = int_to_ptr.hbm [resolvable:$true] %s17_s25 }
   0x4   :  { %s296_s26 = smov 128   ;;  %s297_s27 = smov 8  }
   0x5   :  { %38 = dma.hbm_to_vmem [thread:$0]  %s31_s20, 512, %s33_s22, [#allocation6], %s296_s26, %s296_s26, %s297_s27  }
   0x6   :  { %s298_s28 = smov [#allocation2]   ;;  %s45_s1 = sshll.u32 %s368_s3, 4  ;;  %s46_s1 = int_to_ptr.hbm [resolvable:$true] %s45_s1 }
   0x7   :  { %s19_s29 = sshll.u32 %s298_s28, 4  ;;  %s299_s0 = smov [#allocation7]   ;;  %s20_s29 = int_to_ptr.vmem [resolvable:$true] %s19_s29 }
   0x8   :  { %25 = dma.hbm_to_vmem [thread:$0]  %s18_s25, 256, %s20_s29, [#allocation3], %s296_s26, %s296_s26, %s297_s27  }
   0x9   :  { %s47_s7 = sshll.u32 %s299_s0, 4  ;;  %s48_s7 = int_to_ptr.vmem [resolvable:$true] %s47_s7 }
   0xa   :  { %53 = dma.hbm_to_vmem [thread:$0]  %s46_s1, 512, %s48_s7, [#allocation6], %s296_s26, %s296_s26, %s297_s27  }
   0xb   :  { %289 = dma.done.wait [#allocation3], 256  }
   0xc   :  { %290 = vsyncadd [#allocation3], 4294967040 }
   0xd   :  { %291 = dma.done.wait [#allocation6], 1024  }
   0xe   :  { %292 = vsyncadd [#allocation6], 4294966272  ;;  %v73_v0 = vld [vmem:[#allocation5 + $0x18] sm:$0xff]  ;;  %v72_v1 = vld [vmem:[#allocation5 + $0x10] sm:$0xff]  ;;  %vm78_vm0 = vcmask 261120   ;;  %s155_s14 = sshll.u32 %s370_s5, 4  ;;  %s156_s14 = int_to_ptr.hbm [resolvable:$true] %s155_s14 }
   0xf   :  { %173 = vmatpush.msra.mxu2 %v73_v0  ;;  %97 = vmatpush.msra.mxu0 %v73_v0  ;;  %v71_v2 = vld [vmem:[#allocation5 + $0x8] sm:$0xff]  ;;  %v70_v3 = vld [vmem:[#allocation5] sm:$0xff]  ;;  %v69_v4 = vld [vmem:[#allocation2 + $0x8] sm:$0xff] }
  0x10   :  { %v68_v5 = vld [vmem:[#allocation2] sm:$0xff]  ;;  %v113_v6 = vld [vmem:[#allocation7 + $0x18] sm:$0xff]  ;;  %v111_v8 = vld [vmem:[#allocation7 + $0x8] sm:$0xff] }
  0x11   :  { %174 = vmatpush.msra.mxu2 %v72_v1  ;;  %98 = vmatpush.msra.mxu0 %v72_v1  ;;  %v112_v7 = vld [vmem:[#allocation7 + $0x10] sm:$0xff]  ;;  %v110_v9 = vld [vmem:[#allocation7] sm:$0xff] }
  0x12   :  { %177 = vmatpush.msra.mxu3 %v113_v6  ;;  %136 = vmatpush.msra.mxu1 %v113_v6  ;;  %v187_v10 = vld [vmem:[%s367_s2] ss:$0 sm:$0xff]  ;;  %s300_s2 = smov [#allocation8]  }
  0x13   :  { %175 = vmatpush.msra.mxu2 %v71_v2  ;;  %99 = vmatpush.msra.mxu0 %v71_v2  ;;  %v188_v17 = vld [vmem:[%s369_s4] ss:$0 sm:$0xff]  ;;  %s153_s11 = sshll.u32 %s300_s2, 4  ;;  %s154_s11 = int_to_ptr.vmem [resolvable:$true] %s153_s11 }
  0x14   :  { %178 = vmatpush.msra.mxu3 %v112_v7  ;;  %137 = vmatpush.msra.mxu1 %v112_v7 }
  0x15   :  { %176 = vmatpush.msra.mxu2 %v70_v3  ;;  %100 = vmatpush.msra.mxu0 %v70_v3 }
  0x16   :  { %170 = vmatmul.msk.f32.vlgmr.msra.gmra.mxu2 %vm78_vm0, %v69_v4  ;;  %169 = vmatmul.msk.f32.vlgmr.msra.gmra.mxu0 %vm78_vm0, %v68_v5 }
  0x17   :  { %179 = vmatpush.msra.mxu3 %v111_v8  ;;  %138 = vmatpush.msra.mxu1 %v111_v8 }
  0x19   :  { %180 = vmatpush.msra.mxu3 %v110_v9  ;;  %139 = vmatpush.msra.mxu1 %v110_v9 }
  0x93   :  { %v102_v11 = vpop.f32.mrf.mxu0 }
  0x94   :  { %v103_v12 = vadd.f32 %v187_v10, %v102_v11 }
  0x96   :  { %189 = vtanh.f32 %v103_v12 }
  0x99   :  { %v105_v13 = vpop.f32.mrf.mxu2 }
  0x9a   :  { %v106_v14 = vadd.f32 %v187_v10, %v105_v13 }
  0x9c   :  { %v190_v15 = vpop.eup %189  ;;  %191 = vtanh.f32 %v106_v14 }
  0x9d   :  { %171 = vmatmul.msk.f32.vlgmr.msra.gmra.mxu1 %vm78_vm0, %v190_v15 }
  0xa2   :  { %v192_v16 = vpop.eup %191 }
  0xa3   :  { %172 = vmatmul.msk.f32.vlgmr.msra.gmra.mxu3 %vm78_vm0, %v192_v16 }
 0x11a   :  { %v141_v18 = vpop.f32.mrf.mxu1 }
 0x11b   :  { %v142_v19 = vadd.f32 %v188_v17, %v141_v18 }
 0x11d   :  { %147 = vst [vmem:[#allocation8] sm:$0xff] %v142_v19 }
 0x126   :  { %v144_v20 = vpop.f32.mrf.mxu3 }
 0x127   :  { %v145_v21 = vadd.f32 %v188_v17, %v144_v20 }
 0x129   :  { %148 = vst [vmem:[#allocation8 + $0x8] sm:$0xff] %v145_v21 }
 0x12a   :  { %161 = dma.vmem_to_hbm [thread:$0]  %s154_s11, 256, %s156_s14, [#allocation4], %s296_s26, %s296_s26, %s297_s27  }
 0x12b   :  { %293 = dma.done.wait [#allocation4], 256  }
 0x12c   :  { %294 = vsyncadd [#allocation4], 4294967040 }
 0x12d   :  { %166 = vsyncpa [#allocation3], 1 }
 0x12e   :  { %167 = vsyncpa [#allocation6], 1 }
 0x12f   :  { %168 = vsyncpa [#allocation4], 1 }

</bundles_post_ra>
